<compile_context>
chip_gen: v7x
topology: tpu7x:2x2x1
jax: 0.10.0
libtpu: 0.0.40
codegen_flags: <defaults>
</compile_context>

<pallas_src>
import math

import jax
import jax.numpy as jnp
from jax.experimental import pallas as pl
from jax.experimental.pallas import tpu as pltpu


def _glu_kernel(x_ref, wv_ref, wg_ref, bv_ref, bg_ref, o_ref):
    # x_ref:  (tm, K)   row tile of the flattened input
    # wv_ref: (K, H)    value-half weight (already transposed to K-major)
    # wg_ref: (K, H)    gate-half weight
    # bv_ref: (1, H)    value bias
    # bg_ref: (1, H)    gate bias
    # o_ref:  (tm, H)
    x = x_ref[...]
    val = jnp.dot(x, wv_ref[...], preferred_element_type=jnp.float32) + bv_ref[...]
    gate = jnp.dot(x, wg_ref[...], preferred_element_type=jnp.float32) + bg_ref[...]
    o_ref[...] = (val * jax.nn.sigmoid(gate)).astype(o_ref.dtype)


def _pick_row_tile(m: int, target: int = 256) -> int:
    """Largest multiple of 8 that divides m, capped at `target`; else full m."""
    if m <= target:
        return m
    best = m
    t = min(target, m)
    t -= t % 8
    while t >= 8:
        if m % t == 0:
            best = t
            break
        t -= 8
    return best


def gated_linear_unit(x: jnp.ndarray, weight: jnp.ndarray, bias: jnp.ndarray) -> jnp.ndarray:
    """GLU forward.

    x:      (..., input_size)
    weight: (2*hidden, input_size)   -- PyTorch nn.Linear layout
    bias:   (2*hidden,)
    returns (..., hidden)
    """
    *lead, K = x.shape
    two_h, k_w = weight.shape
    assert k_w == K and two_h % 2 == 0
    H = two_h // 2

    # TODO(synk): nn.Dropout is train-mode-only randomness; at inference it is
    # the identity, so it is intentionally omitted here.

    # Wrapper-side layout plumbing (no compute hoisting):
    #  - flatten leading dims into rows
    #  - split + transpose the fc weight so the kernel output is lane-dense (H wide)
    M = 1
    for d in lead:
        M *= d
    x2d = x.reshape(M, K)
    w_val = jnp.asarray(weight[:H, :].T)            # (K, H)
    w_gate = jnp.asarray(weight[H:, :].T)           # (K, H)
    b_val = jnp.asarray(bias[:H]).reshape(1, H)     # (1, H)
    b_gate = jnp.asarray(bias[H:]).reshape(1, H)    # (1, H)

    tm = _pick_row_tile(M)
    grid = (M // tm,)

    out2d = pl.pallas_call(
        _glu_kernel,
        out_shape=jax.ShapeDtypeStruct((M, H), x.dtype),
        grid_spec=pltpu.PrefetchScalarGridSpec(
            num_scalar_prefetch=0,
            grid=grid,
            in_specs=[
                pl.BlockSpec((tm, K), lambda i: (i, 0)),   # x row tile
                pl.BlockSpec((K, H), lambda i: (0, 0)),    # value weight (resident)
                pl.BlockSpec((K, H), lambda i: (0, 0)),    # gate weight (resident)
                pl.BlockSpec((1, H), lambda i: (0, 0)),    # value bias
                pl.BlockSpec((1, H), lambda i: (0, 0)),    # gate bias
            ],
            out_specs=pl.BlockSpec((tm, H), lambda i: (i, 0)),
        ),
        compiler_params=pltpu.CompilerParams(
            dimension_semantics=("parallel",),
        ),
    )(x2d, w_val, w_gate, b_val, b_gate)

    return out2d.reshape(*lead, H)


def _xavier_uniform(key, shape, dtype=jnp.float32):
    fan_out, fan_in = shape
    limit = math.sqrt(6.0 / (fan_in + fan_out))
    return jax.random.uniform(key, shape, dtype=dtype, minval=-limit, maxval=limit)


if __name__ == "__main__":
    # Small shapes consistent with the module: batch=2, seq=8, input/hidden=32.
    B, S, IN, H = 2, 8, 32, 32

    key = jax.random.PRNGKey(0)
    kx, kw = jax.random.split(key)

    x = jax.random.normal(kx, (B, S, IN), dtype=jnp.float32)
    # fc: Linear(IN, 2*H) — xavier_uniform weight, zero bias (matches init_weights()).
    weight = _xavier_uniform(kw, (2 * H, IN))
    bias = jnp.zeros((2 * H,), dtype=jnp.float32)

    out = gated_linear_unit(x, weight, bias)
    out = jax.block_until_ready(out)

    # Plain-JAX reference of the same forward pass.
    y = x.reshape(-1, IN) @ weight.T + bias
    a, g = y[:, :H], y[:, H:]
    ref = (a * jax.nn.sigmoid(g)).reshape(B, S, H)

    assert out.shape == (B, S, H)
    assert jnp.allclose(out, ref, atol=1e-5, rtol=1e-5)

    print("KERNEL_OK")
</pallas_src>

<mosaic_0001>
module attributes {stable_mosaic.version = 11 : i64} {
  func.func @_glu_kernel(%arg0: i32, %arg1: memref<16x32xf32, #tpu.memory_space<vmem>>, %arg2: memref<32x32xf32, #tpu.memory_space<vmem>>, %arg3: memref<32x32xf32, #tpu.memory_space<vmem>>, %arg4: memref<1x32xf32, #tpu.memory_space<vmem>>, %arg5: memref<1x32xf32, #tpu.memory_space<vmem>>, %arg6: memref<16x32xf32, #tpu.memory_space<vmem>>) attributes {dimension_semantics = [#tpu.dimension_semantics<parallel>], iteration_bounds = array<i64: 1>, scalar_prefetch = 0 : i64, scratch_operands = 0 : i64, tpu.core_type = #tpu.core_type<tc>, window_params = [{transform_indices = @transform_0, window_bounds = array<i64: 16, 32>}, {pipeline_mode = #tpu.pipeline_mode<synchronous>, transform_indices = @transform_1, window_bounds = array<i64: 32, 32>}, {pipeline_mode = #tpu.pipeline_mode<synchronous>, transform_indices = @transform_2, window_bounds = array<i64: 32, 32>}, {pipeline_mode = #tpu.pipeline_mode<synchronous>, transform_indices = @transform_3, window_bounds = array<i64: 1, 32>}, {pipeline_mode = #tpu.pipeline_mode<synchronous>, transform_indices = @transform_4, window_bounds = array<i64: 1, 32>}, {transform_indices = @transform_5, window_bounds = array<i64: 16, 32>}]} {
    %c0 = arith.constant 0 : index
    %c0_0 = arith.constant 0 : index
    %0 = vector.load %arg1[%c0, %c0_0] : memref<16x32xf32, #tpu.memory_space<vmem>>, vector<16x32xf32>
    %c0_1 = arith.constant 0 : index
    %c0_2 = arith.constant 0 : index
    %1 = vector.load %arg2[%c0_1, %c0_2] : memref<32x32xf32, #tpu.memory_space<vmem>>, vector<32x32xf32>
    %cst = arith.constant dense<0.000000e+00> : vector<16x32xf32>
    %2 = tpu.matmul %0, %1, %cst {dimension_numbers = #tpu.dot_dimension_numbers<[1], [0], [0], [1], [0, 0, 1, 1], [], []>} : vector<16x32xf32>, vector<32x32xf32>, vector<16x32xf32> -> vector<16x32xf32>
    %c0_3 = arith.constant 0 : index
    %c0_4 = arith.constant 0 : index
    %3 = vector.load %arg4[%c0_3, %c0_4] : memref<1x32xf32, #tpu.memory_space<vmem>>, vector<1x32xf32>
    %4 = vector.broadcast %3 : vector<1x32xf32> to vector<16x32xf32>
    %5 = arith.addf %2, %4 : vector<16x32xf32>
    %c0_5 = arith.constant 0 : index
    %c0_6 = arith.constant 0 : index
    %6 = vector.load %arg3[%c0_5, %c0_6] : memref<32x32xf32, #tpu.memory_space<vmem>>, vector<32x32xf32>
    %cst_7 = arith.constant dense<0.000000e+00> : vector<16x32xf32>
    %7 = tpu.matmul %0, %6, %cst_7 {dimension_numbers = #tpu.dot_dimension_numbers<[1], [0], [0], [1], [0, 0, 1, 1], [], []>} : vector<16x32xf32>, vector<32x32xf32>, vector<16x32xf32> -> vector<16x32xf32>
    %c0_8 = arith.constant 0 : index
    %c0_9 = arith.constant 0 : index
    %8 = vector.load %arg5[%c0_8, %c0_9] : memref<1x32xf32, #tpu.memory_space<vmem>>, vector<1x32xf32>
    %9 = vector.broadcast %8 : vector<1x32xf32> to vector<16x32xf32>
    %10 = arith.addf %7, %9 : vector<16x32xf32>
    %11 = arith.negf %10 : vector<16x32xf32>
    %12 = math.exp %11 : vector<16x32xf32>
    %cst_10 = arith.constant 1.000000e+00 : f32
    %13 = vector.broadcast %cst_10 : f32 to vector<16x32xf32>
    %14 = arith.addf %13, %12 : vector<16x32xf32>
    %15 = arith.divf %13, %14 : vector<16x32xf32>
    %16 = arith.mulf %5, %15 : vector<16x32xf32>
    %c0_11 = arith.constant 0 : index
    %c0_12 = arith.constant 0 : index
    %17 = vector.load %arg6[%c0_11, %c0_12] : memref<16x32xf32, #tpu.memory_space<vmem>>, vector<16x32xf32>
    tpu.vector_store %arg6[%c0_11, %c0_12], %16 {strides = array<i32>} : memref<16x32xf32, #tpu.memory_space<vmem>>, vector<16x32xf32>,
    return
  }
  func.func @transform_0(%arg0: i32) -> (i32, i32) {
    %c0_i32 = arith.constant 0 : i32
    %c0_i32_0 = arith.constant 0 : i32
    return %arg0, %c0_i32 : i32, i32
  }
  func.func @transform_1(%arg0: i32) -> (i32, i32) {
    %c0_i32 = arith.constant 0 : i32
    %c0_i32_0 = arith.constant 0 : i32
    %c0_i32_1 = arith.constant 0 : i32
    return %c0_i32, %c0_i32_0 : i32, i32
  }
  func.func @transform_2(%arg0: i32) -> (i32, i32) {
    %c0_i32 = arith.constant 0 : i32
    %c0_i32_0 = arith.constant 0 : i32
    %c0_i32_1 = arith.constant 0 : i32
    return %c0_i32, %c0_i32_0 : i32, i32
  }
  func.func @transform_3(%arg0: i32) -> (i32, i32) {
    %c0_i32 = arith.constant 0 : i32
    %c0_i32_0 = arith.constant 0 : i32
    %c0_i32_1 = arith.constant 0 : i32
    return %c0_i32, %c0_i32_0 : i32, i32
  }
  func.func @transform_4(%arg0: i32) -> (i32, i32) {
    %c0_i32 = arith.constant 0 : i32
    %c0_i32_0 = arith.constant 0 : i32
    %c0_i32_1 = arith.constant 0 : i32
    return %c0_i32, %c0_i32_0 : i32, i32
  }
  func.func @transform_5(%arg0: i32) -> (i32, i32) {
    %c0_i32 = arith.constant 0 : i32
    %c0_i32_0 = arith.constant 0 : i32
    return %arg0, %c0_i32 : i32, i32
  }
}

</mosaic_0001>

<bundles_post_ra>
// kernel: tpu_custom_call.1
= control target key start
LH: loop header
LB: loop body
LE: loop exit
PB: predicated region body
PF: predicated region fallthrough
CT: control target
= control target key end

     0   :  { %10 = vsyncpa [#allocation3], 0  ;;  %s558_s0 = inlined_call_operand.hbm [shape: f32[16,32], index: 0, kind: input, shape index: {}]   ;;  %s559_s1 = inlined_call_operand.hbm [shape: f32[32,32], index: 1, kind: input, shape index: {}]   ;;  %s560_s2 = inlined_call_operand.hbm [shape: f32[32,32], index: 2, kind: input, shape index: {}]   ;;  %s561_s3 = inlined_call_operand.vmem [shape: f32[1,32], index: 3, kind: input, shape index: {}]   ;;  %s562_s4 = inlined_call_operand.vmem [shape: f32[1,32], index: 4, kind: input, shape index: {}]   ;;  %s563_s5 = inlined_call_operand.hbm [shape: f32[16,32], index: 5, kind: output, shape index: {}]  }
   0x1   :  { %11 = vsyncpa [#allocation6], 0 }
   0x2   :  { %12 = vsyncpa [#allocation4], 0  ;;  %s443_s18 = smov [#allocation5]   ;;  %s444_s20 = smov [#allocation2]  }
   0x3   :  { %s30_s19 = sshll.u32 %s443_s18, 4  ;;  %s18_s21 = sshll.u32 %s444_s20, 4  ;;  %s31_s19 = int_to_ptr.vmem [resolvable:$true] %s30_s19  ;;  %s479_s21 = int_to_ptr.vmem [resolvable:$true] %s18_s21 }
   0x4   :  { %s349_s24 = scalar_lea.hbm %s559_s1, 512 }
   0x5   :  { %p350_p0 = scmp.ne.s32.totalorder %s559_s1, %s349_s24  ;;  %p353_p1 = scmp.lt.u32.totalorder %s349_s24, %s559_s1 }
   0x7   :  { %p355_p2 = pnand %p353_p1, %p350_p0 }
   0x9   :  { %358 = shalt.err (!%p355_p2)
}
   0xa   :  { %s359_s29 = scalar_lea.vmem %s31_s19, 512  ;;  %p364_p4 = scmp.lt.s32.totalorder %s31_s19, %s31_s19 }
   0xb   :  { %p360_p3 = scmp.ne.s32.totalorder %s31_s19, %s359_s29  ;;  %p365_p5 = scmp.lt.s32.totalorder %s359_s29, %s359_s29 }
   0xd   :  { %p366_p6 = por %p365_p5, %p364_p4 }
   0xf   :  { %p367_p7 = pnand %p366_p6, %p360_p3 }
  0x11   :  { %370 = shalt.err (!%p367_p7)
}
  0x12   :  { %s445_s30 = smov 128   ;;  %s446_s6 = smov 8  }
  0x13   :  { %36 = dma.hbm_to_vmem [thread:$0]  %s559_s1, 512, %s31_s19, [#allocation6], %s445_s30, %s445_s30, %s446_s6  }
  0x14   :  { %s371_s11 = scalar_lea.hbm %s558_s0, 256 }
  0x15   :  { %p372_p8 = scmp.ne.s32.totalorder %s558_s0, %s371_s11  ;;  %p375_p9 = scmp.lt.u32.totalorder %s371_s11, %s558_s0 }
  0x17   :  { %p377_p10 = pnand %p375_p9, %p372_p8 }
  0x19   :  { %380 = shalt.err (!%p377_p10)
}
  0x1a   :  { %s381_s16 = scalar_lea.vmem %s479_s21, 256  ;;  %p386_p12 = scmp.lt.s32.totalorder %s479_s21, %s479_s21 }
  0x1b   :  { %p382_p11 = scmp.ne.s32.totalorder %s479_s21, %s381_s16  ;;  %p387_p13 = scmp.lt.s32.totalorder %s381_s16, %s381_s16 }
  0x1d   :  { %p388_p0 = por %p387_p13, %p386_p12 }
  0x1f   :  { %p389_p1 = pnand %p388_p0, %p382_p11 }
  0x21   :  { %392 = shalt.err (!%p389_p1)
}
  0x22   :  { %24 = dma.hbm_to_vmem [thread:$0]  %s558_s0, 256, %s479_s21, [#allocation3], %s445_s30, %s445_s30, %s446_s6  }
  0x23   :  { %s447_s18 = smov [#allocation7]   ;;  %s393_s23 = scalar_lea.hbm %s560_s2, 512 }
  0x24   :  { %s42_s19 = sshll.u32 %s447_s18, 4  ;;  %p394_p2 = scmp.ne.s32.totalorder %s560_s2, %s393_s23  ;;  %s43_s19 = int_to_ptr.vmem [resolvable:$true] %s42_s19 }
  0x25   :  { %p397_p3 = scmp.lt.u32.totalorder %s393_s23, %s560_s2 }
  0x27   :  { %p399_p4 = pnand %p397_p3, %p394_p2 }
  0x29   :  { %402 = shalt.err (!%p399_p4)
}
  0x2a   :  { %s403_s28 = scalar_lea.vmem %s43_s19, 512  ;;  %p408_p6 = scmp.lt.s32.totalorder %s43_s19, %s43_s19 }
  0x2b   :  { %p404_p5 = scmp.ne.s32.totalorder %s43_s19, %s403_s28  ;;  %p409_p7 = scmp.lt.s32.totalorder %s403_s28, %s403_s28 }
  0x2d   :  { %p410_p8 = por %p409_p7, %p408_p6 }
  0x2f   :  { %p411_p9 = pnand %p410_p8, %p404_p5 }
  0x31   :  { %414 = shalt.err (!%p411_p9)
}
  0x32   :  { %48 = dma.hbm_to_vmem [thread:$0]  %s560_s2, 512, %s43_s19, [#allocation6], %s445_s30, %s445_s30, %s446_s6  }
  0x33   :  { %437 = dma.done.wait [#allocation3], 256  }
  0x34   :  { %438 = vsyncadd [#allocation3], 4294967040 }
  0x35   :  { %439 = dma.done.wait [#allocation6], 1024  }
  0x36   :  { %440 = vsyncadd [#allocation6], 4294966272  ;;  %vm75_vm0 = vcmask 261120   ;;  %v157_v0 = vld [vmem:[#allocation7] sm:$0xff]  ;;  %v158_v1 = vld [vmem:[#allocation7 + $0x8] sm:$0xff] }
  0x37   :  { %v159_v2 = vld [vmem:[#allocation7 + $0x10] sm:$0xff]  ;;  %v327_v3 = vpack.c.bf16 %v158_v1, %v157_v0  ;;  %v160_v4 = vld [vmem:[#allocation7 + $0x18] sm:$0xff]  ;;  %v64_v7 = vld [vmem:[#allocation5] sm:$0xff] }
  0x38   :  { %v62_v5 = vld [vmem:[#allocation2] sm:$0xff]  ;;  %v331_v6 = vpack.c.bf16 %v160_v4, %v159_v2  ;;  %v65_v8 = vld [vmem:[#allocation5 + $0x8] sm:$0xff]  ;;  %v67_v11 = vld [vmem:[#allocation5 + $0x18] sm:$0xff] }
  0x39   :  { %316 = vmatprep.mubr.msk.f32.mxu1 %vm75_vm0, %v62_v5  ;;  %v66_v9 = vld [vmem:[#allocation5 + $0x10] sm:$0xff]  ;;  %305 = vmatprep.mubr.msk.f32.mxu0 %vm75_vm0, %v62_v5  ;;  %v319_v10 = vpack.c.bf16 %v65_v8, %v64_v7  ;;  %v63_v13 = vld [vmem:[#allocation2 + $0x8] sm:$0xff] }
  0x3a   :  { %328 = vmatprep.subr.bf16.mxu1 %v327_v3  ;;  %v323_v12 = vpack.c.bf16 %v67_v11, %v66_v9  ;;  %v280_v14 = vld [vmem:[%s562_s4] ss:$0 sm:$0xff]  ;;  %s448_s4 = smov [#allocation8]  }
  0x3b   :  { %330 = vmatpush3.bf16.msra.mxu1 %v327_v3  ;;  %320 = vmatprep.subr.bf16.mxu0 %v319_v10  ;;  %v277_v27 = vld [vmem:[%s561_s3] ss:$0 sm:$0xff]  ;;  %s264_s9 = sshll.u32 %s448_s4, 4  ;;  %s265_s9 = int_to_ptr.vmem [resolvable:$true] %s264_s9 }
  0x3c   :  { %332 = vmatprep.subr.bf16.mxu1 %v331_v6  ;;  %322 = vmatpush3.bf16.msra.mxu0 %v319_v10  ;;  %s415_s10 = scalar_lea.vmem %s265_s9, 256  ;;  %p420_p11 = scmp.lt.s32.totalorder %s265_s9, %s265_s9 }
  0x3d   :  { %324 = vmatprep.subr.bf16.mxu0 %v323_v12  ;;  %p416_p10 = scmp.ne.s32.totalorder %s265_s9, %s415_s10  ;;  %p421_p12 = scmp.lt.s32.totalorder %s415_s10, %s415_s10 }
  0x3f   :  { %334 = vmatpush3.bf16.msra.mxu1 %v331_v6  ;;  %p422_p13 = por %p421_p12, %p420_p11 }
  0x40   :  { %326 = vmatpush3.bf16.msra.mxu0 %v323_v12 }
  0x41   :  { %p423_p0 = pnand %p422_p13, %p416_p10 }
  0x42   :  { %317 = vmatmul.mubr.msk.f32.vlgmr.msra.gmra.mrb[0].mxu1 %vm75_vm0, %v63_v13 }
  0x43   :  { %306 = vmatmul.mubr.msk.f32.vlgmr.msra.gmra.mrb[0].mxu0 %vm75_vm0, %v63_v13 }
 0x115   :  { %v318_v15 = vpop.f32.mrb[0].mxu1 }
 0x116   :  { %v240_v16 = vadd.f32 %v318_v15, %v280_v14  ;;  %v234_v17 = vpop.f32.mrb[1].mxu1  ;;  %v307_v19 = vpop.f32.mrb[0].mxu0 }
 0x117   :  { %v235_v18 = vadd.f32 %v280_v14, %v234_v17  ;;  %v148_v21 = vpop.f32.mrb[1].mxu0  ;;  %v154_v28 = vadd.f32 %v307_v19, %v277_v27 }
 0x118   :  { %v284_v20 = vmul.f32 -1.442695, %v240_v16  ;;  %v149_v29 = vadd.f32 %v277_v27, %v148_v21 }
 0x119   :  { %v283_v22 = vmul.f32 -1.442695, %v235_v18 }
 0x11a   :  { %341 = vpow2.f32 %v284_v20 }
 0x11b   :  { %343 = vpow2.f32 %v283_v22 }
 0x124   :  { %v342_v23 = vpop.eup %341 }
 0x125   :  { %v344_v24 = vpop.eup %343  ;;  %v250_v25 = vadd.f32 1.0, %v342_v23 }
 0x126   :  { %v249_v26 = vadd.f32 1.0, %v344_v24 }
 0x127   :  { %345 = vrcp.f32 %v250_v25 }
 0x128   :  { %347 = vrcp.f32 %v249_v26 }
 0x131   :  { %v346_v30 = vpop.eup %345 }
 0x132   :  { %v348_v31 = vpop.eup %347  ;;  %v256_v32 = vmul.f32 %v346_v30, %v154_v28 }
 0x133   :  { %v255_v33 = vmul.f32 %v348_v31, %v149_v29 }
 0x134   :  { %258 = vst.msk [vmem:[#allocation8 + $0x8] sm:$0xff] %vm75_vm0, %v256_v32 }
 0x135   :  { %257 = vst.msk [vmem:[#allocation8] sm:$0xff] %vm75_vm0, %v255_v33 }
 0x136   :  { %426 = shalt.err (!%p423_p0)
}
 0x137   :  { %s427_s12 = scalar_lea.hbm %s563_s5, 256 }
 0x138   :  { %p428_p1 = scmp.ne.s32.totalorder %s563_s5, %s427_s12  ;;  %p431_p2 = scmp.lt.u32.totalorder %s427_s12, %s563_s5 }
 0x13a   :  { %p433_p3 = pnand %p431_p2, %p428_p1 }
 0x13c   :  { %436 = shalt.err (!%p433_p3)
}
 0x13d   :  { %270 = dma.vmem_to_hbm [thread:$0]  %s265_s9, 256, %s563_s5, [#allocation4], %s445_s30, %s445_s30, %s446_s6  }
 0x13e   :  { %441 = dma.done.wait [#allocation4], 256  }
 0x13f   :  { %442 = vsyncadd [#allocation4], 4294967040 }
 0x140   :  { %274 = vsyncpa [#allocation3], 1 }
 0x141   :  { %275 = vsyncpa [#allocation6], 1 }
 0x142   :  { %276 = vsyncpa [#allocation4], 1 }

</bundles_post_ra>
